<compile_context>
chip_gen: v7x
topology: tpu7x:2x2x1
jax: 0.10.0
libtpu: 0.0.40
codegen_flags: <defaults>
</compile_context>

<pallas_src>
import jax
import jax.numpy as jnp
from jax import lax
from jax.experimental import pallas as pl
from jax.experimental.pallas import tpu as pltpu

_NEG_BIG = -1e30                      # NOT -inf: 0 * -inf would NaN the label-logit gather
_VMEM_FLOOR = 32 * 1024 * 1024
_VMEM_CAP = 48 * 1024 * 1024          # leave headroom under v7x's 64 MiB physical VMEM
_X_BUDGET = 24 * 1024 * 1024          # double-buffered budget for the dominant row stream


def _round_up(a, m):
    return ((a + m - 1) // m) * m


def _pick_tile(batch, row_bytes, cap=2048):
    """Largest batch tile (multiple of 16, <= cap) whose double-buffered row stream fits."""
    b16 = _round_up(max(batch, 1), 16)
    tm = min(cap, b16)
    while tm > 16 and 2 * tm * row_bytes > _X_BUDGET:
        tm = max(16, tm // 2)
    if tm < b16:                       # >1 tile: keep the (1, tm) row outputs lane-dense
        tm = _round_up(tm, 128)
    return tm


def _vmem_limit(*block_bytes):
    need = 2 * sum(block_bytes) + (2 << 20)
    return int(min(_VMEM_CAP, max(_VMEM_FLOOR, need)))


def _pad_classes(logits):
    """Pad the class dim to a lane-dense multiple of 128 with a -1e30 poison value."""
    k = logits.shape[1]
    kp = _round_up(k, 128)
    if kp != k:
        logits = jnp.pad(logits, ((0, 0), (0, kp - k)), constant_values=_NEG_BIG)
    return logits


# ----------------------------------------------------------------------------
# Shared in-kernel math: per-row cross entropy + top-1 correctness (masked rows -> 0)
# ----------------------------------------------------------------------------
def _ce_rows(logits, labels, valid):
    kp = logits.shape[-1]
    k_ids = lax.broadcasted_iota(jnp.int32, logits.shape, 1)
    m = jnp.max(logits, axis=-1, keepdims=True)
    lse = jnp.log(jnp.sum(jnp.exp(logits - m), axis=-1, keepdims=True)) + m
    onehot = (k_ids == labels).astype(jnp.float32)
    label_logit = jnp.sum(logits * onehot, axis=-1, keepdims=True)
    nll = jnp.where(valid, lse - label_logit, 0.0)
    # first index attaining the max (matches torch / jnp argmax tie-breaking)
    pred = jnp.min(jnp.where(logits == m, k_ids, kp), axis=-1, keepdims=True)
    correct = jnp.where(jnp.logical_and(valid, pred == labels), 1.0, 0.0)
    return nll, correct


# ----------------------------------------------------------------------------
# Forward: logits = bf16(x) @ W + b  (batch-tiled, W/b resident, bf16 lane-dense out)
# ----------------------------------------------------------------------------
def _linear_kernel(x_ref, w_ref, b_ref, o_ref):
    x = x_ref[...].astype(jnp.bfloat16)                   # in-kernel cast (no wrapper pass)
    o_ref[...] = (jnp.dot(x, w_ref[...], preferred_element_type=jnp.float32)
                  + b_ref[...]).astype(o_ref.dtype)


def linear_forward(x_flat, w_pad, b_pad):
    b, d = x_flat.shape
    kp = w_pad.shape[1]
    tm = _pick_tile(b, d * 4)
    n = (b + tm - 1) // tm
    return pl.pallas_call(
        _linear_kernel,
        out_shape=jax.ShapeDtypeStruct((n * tm, kp), jnp.bfloat16),
        grid_spec=pltpu.PrefetchScalarGridSpec(
            num_scalar_prefetch=0,
            grid=(n,),
            in_specs=[
                pl.BlockSpec((tm, d), lambda i: (i, 0)),        # f32 batch tile of x
                pl.BlockSpec((d, kp), lambda i: (0, 0)),        # resident bf16 weight
                pl.BlockSpec((1, kp), lambda i: (0, 0)),        # resident poisoned bias
            ],
            out_specs=pl.BlockSpec((tm, kp), lambda i: (i, 0)),
        ),
        compiler_params=pltpu.CompilerParams(
            dimension_semantics=("parallel",),
            vmem_limit_bytes=_vmem_limit(tm * d * 4, d * kp * 2, kp * 4, tm * kp * 2),
        ),
    )(x_flat, w_pad, b_pad)


# ----------------------------------------------------------------------------
# Fused cross-entropy loss + accuracy + per-row compare (one pass over logits).
# Lane-dense (1, tm) per-row outputs; grid fully parallel; tiny final sums in JAX.
# ----------------------------------------------------------------------------
def _make_metrics_kernel(batch, tm):
    def kernel(logits_ref, labels_ref, nll_ref, cmp_ref):
        i = pl.program_id(0)
        logits = logits_ref[...].astype(jnp.float32)            # (tm, Kp)
        labels = labels_ref[...]                                 # (tm, 1) int32
        row = i * tm + lax.broadcasted_iota(jnp.int32, (tm, 1), 0)
        nll, correct = _ce_rows(logits, labels, row < batch)
        nll_ref[...] = nll.reshape(1, tm)                        # lane-dense row outputs
        cmp_ref[...] = correct.reshape(1, tm)
    return kernel


def cross_entropy_and_accuracy(logits, labels):
    """One kernel launch -> (mean CE loss, accuracy, per-row compare)."""
    b = labels.shape[0]
    logits = _pad_classes(logits)                                # no-op if already lane-dense
    kp = logits.shape[1]
    tm = _pick_tile(b, kp * logits.dtype.itemsize)
    n = (b + tm - 1) // tm
    labels2 = labels.astype(jnp.int32).reshape(b, 1)
    nll, cmp = pl.pallas_call(
        _make_metrics_kernel(b, tm),
        out_shape=(jax.ShapeDtypeStruct((1, n * tm), jnp.float32),
                   jax.ShapeDtypeStruct((1, n * tm), jnp.float32)),
        grid_spec=pltpu.PrefetchScalarGridSpec(
            num_scalar_prefetch=0,
            grid=(n,),
            in_specs=[
                pl.BlockSpec((tm, kp), lambda i: (i, 0)),
                pl.BlockSpec((tm, 1), lambda i: (i, 0)),
            ],
            out_specs=(pl.BlockSpec((1, tm), lambda i: (0, i)),
                       pl.BlockSpec((1, tm), lambda i: (0, i))),
        ),
        compiler_params=pltpu.CompilerParams(dimension_semantics=("parallel",)),
    )(logits, labels2)
    inv_b = 1.0 / b
    return jnp.sum(nll) * inv_b, jnp.sum(cmp) * inv_b, cmp[0, :b]


# ----------------------------------------------------------------------------
# predict: argmax over classes, lane-dense (1, tm) int32 output
# ----------------------------------------------------------------------------
def _make_argmax_kernel(tm):
    def kernel(logits_ref, pred_ref):
        logits = logits_ref[...].astype(jnp.float32)
        kp = logits.shape[-1]
        m = jnp.max(logits, axis=-1, keepdims=True)
        k_ids = lax.broadcasted_iota(jnp.int32, logits.shape, 1)
        pred = jnp.min(jnp.where(logits == m, k_ids, kp), axis=-1, keepdims=True)
        pred_ref[...] = pred.reshape(1, tm)
    return kernel


def predict_argmax(logits):
    b = logits.shape[0]
    logits = _pad_classes(logits)
    kp = logits.shape[1]
    tm = _pick_tile(b, kp * logits.dtype.itemsize)
    n = (b + tm - 1) // tm
    pred = pl.pallas_call(
        _make_argmax_kernel(tm),
        out_shape=jax.ShapeDtypeStruct((1, n * tm), jnp.int32),
        grid_spec=pltpu.PrefetchScalarGridSpec(
            num_scalar_prefetch=0,
            grid=(n,),
            in_specs=[pl.BlockSpec((tm, kp), lambda i: (i, 0))],
            out_specs=pl.BlockSpec((1, tm), lambda i: (0, i)),
        ),
        compiler_params=pltpu.CompilerParams(dimension_semantics=("parallel",)),
    )(logits)
    return pred[0, :b]


# ----------------------------------------------------------------------------
# Fully fused forward + loss + accuracy (logits never touch HBM)
# ----------------------------------------------------------------------------
def _make_fused_kernel(batch, tm):
    def kernel(x_ref, w_ref, b_ref, labels_ref, nll_ref, cmp_ref):
        i = pl.program_id(0)
        x = x_ref[...].astype(jnp.bfloat16)
        logits = jnp.dot(x, w_ref[...], preferred_element_type=jnp.float32) + b_ref[...]
        labels = labels_ref[...]
        row = i * tm + lax.broadcasted_iota(jnp.int32, (tm, 1), 0)
        nll, correct = _ce_rows(logits, labels, row < batch)
        nll_ref[...] = nll.reshape(1, tm)
        cmp_ref[...] = correct.reshape(1, tm)
    return kernel


def fused_forward_loss_accuracy(x_flat, w_pad, b_pad, labels):
    b, d = x_flat.shape
    kp = w_pad.shape[1]
    tm = _pick_tile(b, d * 4)
    n = (b + tm - 1) // tm
    labels2 = labels.astype(jnp.int32).reshape(b, 1)
    nll, cmp = pl.pallas_call(
        _make_fused_kernel(b, tm),
        out_shape=(jax.ShapeDtypeStruct((1, n * tm), jnp.float32),
                   jax.ShapeDtypeStruct((1, n * tm), jnp.float32)),
        grid_spec=pltpu.PrefetchScalarGridSpec(
            num_scalar_prefetch=0,
            grid=(n,),
            in_specs=[
                pl.BlockSpec((tm, d), lambda i: (i, 0)),
                pl.BlockSpec((d, kp), lambda i: (0, 0)),
                pl.BlockSpec((1, kp), lambda i: (0, 0)),
                pl.BlockSpec((tm, 1), lambda i: (i, 0)),
            ],
            out_specs=(pl.BlockSpec((1, tm), lambda i: (0, i)),
                       pl.BlockSpec((1, tm), lambda i: (0, i))),
        ),
        compiler_params=pltpu.CompilerParams(
            dimension_semantics=("parallel",),
            vmem_limit_bytes=_vmem_limit(tm * d * 4, d * kp * 2, kp * 4, tm * 4, 2 * tm * 4),
        ),
    )(x_flat, w_pad, b_pad, labels2)
    inv_b = 1.0 / b
    return jnp.sum(nll) * inv_b, jnp.sum(cmp) * inv_b


# ----------------------------------------------------------------------------
# Model wrapper (deterministic synthetic Linear head; W bf16, bias poison-padded)
# ----------------------------------------------------------------------------
class ClassificationModelPallas:
    def __init__(self, in_shape=(4, 16, 16), num_classes=10, key=None):
        c, h, w = in_shape
        d = c * h * w
        key = jax.random.PRNGKey(42) if key is None else key
        kw, kb = jax.random.split(key)
        self.num_classes = num_classes
        kp = _round_up(num_classes, 128)
        wgt = jax.random.normal(kw, (d, num_classes), jnp.float32) * 0.02
        bias = jax.random.normal(kb, (1, num_classes), jnp.float32) * 0.02
        self.w = jnp.pad(wgt, ((0, 0), (0, kp - num_classes))).astype(jnp.bfloat16)
        # padded class lanes get a -1e30 bias so logits come out pre-poisoned
        self.b = jnp.pad(bias, ((0, 0), (0, kp - num_classes)),
                         constant_values=_NEG_BIG).astype(jnp.float32)

    def forward_padded(self, x):
        """Lane-dense (B, 128) bf16 logits (padded lanes ~ -1e30). Preferred for metrics."""
        b = x.shape[0]
        out = linear_forward(x.reshape(b, -1), self.w, self.b)
        return out if out.shape[0] == b else out[:b]

    def forward(self, x):
        """Torch-like API: (B, num_classes) logits."""
        return self.forward_padded(x)[:, :self.num_classes].astype(jnp.float32)

    def metrics(self, batch):
        """One kernel launch -> (loss, accuracy, per-row compare)."""
        logits, labels = batch
        return cross_entropy_and_accuracy(logits, labels)

    def loss(self, batch):
        logits, labels = batch
        return cross_entropy_and_accuracy(logits, labels)[0]

    def accuracy(self, batch, averaged=True):
        logits, labels = batch
        _, acc, cmp = cross_entropy_and_accuracy(logits, labels)
        return acc if averaged else cmp

    def predict(self, logits):
        return predict_argmax(logits)

    def loss_and_accuracy(self, x, labels):
        """Fused path: x -> (mean CE loss, accuracy) without writing logits to HBM."""
        b = x.shape[0]
        return fused_forward_loss_accuracy(x.reshape(b, -1), self.w, self.b, labels)


if __name__ == "__main__":
    key = jax.random.PRNGKey(0)
    kx, kl = jax.random.split(key)

    B, C, H, W, K = 2, 4, 16, 16, 10
    x = jax.random.normal(kx, (B, C, H, W), jnp.float32)        # NCHW, like PyTorch
    labels = jax.random.randint(kl, (B,), 0, K, jnp.int32)

    model = ClassificationModelPallas(in_shape=(C, H, W), num_classes=K)

    logits = model.forward(x)                    # (B, K) public, torch-like
    logits_pad = model.forward_padded(x)         # (B, 128) lane-dense, preferred path
    loss, acc, cmp = model.metrics((logits_pad, labels))
    pred = model.predict(logits_pad)
    loss_narrow = model.loss((logits, labels))   # narrow-logit public path also works
    acc_narrow = model.accuracy((logits, labels))
    fused_loss, fused_acc = model.loss_and_accuracy(x, labels)
    jax.block_until_ready((logits, logits_pad, loss, acc, cmp, pred,
                           loss_narrow, acc_narrow, fused_loss, fused_acc))

    # pure-JAX reference checks
    x_flat = x.reshape(B, -1)
    ref_full = jnp.dot(x_flat.astype(jnp.bfloat16), model.w,
                       preferred_element_type=jnp.float32) + model.b
    ref_logits = ref_full[:, :K]

    assert logits.shape == (B, K)
    assert jnp.allclose(logits, ref_logits, atol=5e-2, rtol=5e-2)

    lg = logits_pad[:, :K].astype(jnp.float32)   # exactly what the metric kernels consumed
    ref_lse = jax.nn.logsumexp(lg, axis=-1)
    ref_loss = jnp.mean(ref_lse - lg[jnp.arange(B), labels])
    ref_pred = jnp.argmax(lg, axis=1)
    ref_acc = jnp.mean((ref_pred == labels).astype(jnp.float32))

    assert jnp.allclose(loss, ref_loss, atol=1e-3)
    assert jnp.allclose(acc, ref_acc, atol=1e-6)
    assert bool(jnp.all(pred == ref_pred))
    assert cmp.shape == (B,)
    assert jnp.allclose(loss_narrow, ref_loss, atol=1e-3)
    assert jnp.allclose(acc_narrow, ref_acc, atol=1e-6)

    # fused path keeps f32 logits in VMEM -> compare against the f32 reference
    ref_f_lse = jax.nn.logsumexp(ref_logits, axis=-1)
    ref_f_loss = jnp.mean(ref_f_lse - ref_logits[jnp.arange(B), labels])
    ref_f_acc = jnp.mean((jnp.argmax(ref_logits, axis=1) == labels).astype(jnp.float32))
    assert jnp.allclose(fused_loss, ref_f_loss, atol=1e-3)
    assert jnp.allclose(fused_acc, ref_f_acc, atol=1e-6)

    print("KERNEL_OK")
</pallas_src>

<mosaic_0001>
module attributes {stable_mosaic.version = 11 : i64} {
  func.func @_linear_kernel(%arg0: i32, %arg1: memref<16x1024xf32, #tpu.memory_space<vmem>>, %arg2: memref<1024x128xbf16, #tpu.memory_space<vmem>>, %arg3: memref<1x128xf32, #tpu.memory_space<vmem>>, %arg4: memref<16x128xbf16, #tpu.memory_space<vmem>>) attributes {dimension_semantics = [#tpu.dimension_semantics<parallel>], iteration_bounds = array<i64: 1>, scalar_prefetch = 0 : i64, scratch_operands = 0 : i64, tpu.core_type = #tpu.core_type<tc>, window_params = [{transform_indices = @transform_0, window_bounds = array<i64: 16, 1024>}, {pipeline_mode = #tpu.pipeline_mode<synchronous>, transform_indices = @transform_1, window_bounds = array<i64: 1024, 128>}, {pipeline_mode = #tpu.pipeline_mode<synchronous>, transform_indices = @transform_2, window_bounds = array<i64: 1, 128>}, {transform_indices = @transform_3, window_bounds = array<i64: 16, 128>}]} {
    %c0 = arith.constant 0 : index
    %c0_0 = arith.constant 0 : index
    %0 = vector.load %arg1[%c0, %c0_0] : memref<16x1024xf32, #tpu.memory_space<vmem>>, vector<16x1024xf32>
    %1 = arith.truncf %0 : vector<16x1024xf32> to vector<16x1024xbf16>
    %c0_1 = arith.constant 0 : index
    %c0_2 = arith.constant 0 : index
    %2 = vector.load %arg2[%c0_1, %c0_2] : memref<1024x128xbf16, #tpu.memory_space<vmem>>, vector<1024x128xbf16>
    %cst = arith.constant dense<0.000000e+00> : vector<16x128xf32>
    %3 = tpu.matmul %1, %2, %cst {dimension_numbers = #tpu.dot_dimension_numbers<[1], [0], [0], [1], [0, 0, 1, 1], [], []>} : vector<16x1024xbf16>, vector<1024x128xbf16>, vector<16x128xf32> -> vector<16x128xf32>
    %c0_3 = arith.constant 0 : index
    %c0_4 = arith.constant 0 : index
    %4 = vector.load %arg3[%c0_3, %c0_4] : memref<1x128xf32, #tpu.memory_space<vmem>>, vector<1x128xf32>
    %5 = vector.broadcast %4 : vector<1x128xf32> to vector<16x128xf32>
    %6 = arith.addf %3, %5 : vector<16x128xf32>
    %7 = arith.truncf %6 : vector<16x128xf32> to vector<16x128xbf16>
    %c0_5 = arith.constant 0 : index
    %c0_6 = arith.constant 0 : index
    %8 = vector.load %arg4[%c0_5, %c0_6] : memref<16x128xbf16, #tpu.memory_space<vmem>>, vector<16x128xbf16>
    tpu.vector_store %arg4[%c0_5, %c0_6], %7 {strides = array<i32>} : memref<16x128xbf16, #tpu.memory_space<vmem>>, vector<16x128xbf16>,
    return
  }
  func.func @transform_0(%arg0: i32) -> (i32, i32) {
    %c0_i32 = arith.constant 0 : i32
    %c0_i32_0 = arith.constant 0 : i32
    return %arg0, %c0_i32 : i32, i32
  }
  func.func @transform_1(%arg0: i32) -> (i32, i32) {
    %c0_i32 = arith.constant 0 : i32
    %c0_i32_0 = arith.constant 0 : i32
    %c0_i32_1 = arith.constant 0 : i32
    return %c0_i32, %c0_i32_0 : i32, i32
  }
  func.func @transform_2(%arg0: i32) -> (i32, i32) {
    %c0_i32 = arith.constant 0 : i32
    %c0_i32_0 = arith.constant 0 : i32
    %c0_i32_1 = arith.constant 0 : i32
    return %c0_i32, %c0_i32_0 : i32, i32
  }
  func.func @transform_3(%arg0: i32) -> (i32, i32) {
    %c0_i32 = arith.constant 0 : i32
    %c0_i32_0 = arith.constant 0 : i32
    return %arg0, %c0_i32 : i32, i32
  }
}

</mosaic_0001>

<bundles_post_ra>
// kernel: tpu_custom_call.1
= control target key start
LH: loop header
LB: loop body
LE: loop exit
PB: predicated region body
PF: predicated region fallthrough
CT: control target
= control target key end

     0   :  { %8 = vsyncpa [#allocation3], 0  ;;  %s1376_s0 = inlined_call_operand.hbm [shape: f32[2,1024], index: 0, kind: input, shape index: {}]   ;;  %s1377_s1 = inlined_call_operand.hbm [shape: bf16[1024,128], index: 1, kind: input, shape index: {}]   ;;  %s1378_s2 = inlined_call_operand.vmem [shape: f32[1,128], index: 2, kind: input, shape index: {}]   ;;  %s1379_s3 = inlined_call_operand.hbm [shape: bf16[16,128], index: 3, kind: output, shape index: {}]  }
   0x1   :  { %9 = vsyncpa [#allocation6], 0 }
   0x2   :  { %10 = vsyncpa [#allocation4], 0 }
   0x3   :  { %15 = vsyncadd [#allocation3], 1792  ;;  %s1285_s12 = smov [#allocation2]   ;;  %s1213_s16 = scalar_lea.hbm %s1376_s0, 256 }
   0x4   :  { %s16_s13 = sshll.u32 %s1285_s12, 4  ;;  %p1214_p0 = scmp.ne.s32.totalorder %s1376_s0, %s1213_s16  ;;  %s17_s13 = int_to_ptr.vmem [resolvable:$true] %s16_s13 }
   0x5   :  { %p1217_p1 = scmp.lt.u32.totalorder %s1213_s16, %s1376_s0 }
   0x7   :  { %p1219_p2 = pnand %p1217_p1, %p1214_p0 }
   0x9   :  { %1222 = shalt.err (!%p1219_p2)
}
   0xa   :  { %s1223_s21 = scalar_lea.vmem %s17_s13, 256  ;;  %s1227_s22 = scalar_lea.vmem %s17_s13, 2048 }
   0xb   :  { %p1224_p3 = scmp.ne.s32.totalorder %s17_s13, %s1223_s21  ;;  %p1228_p4 = scmp.lt.s32.totalorder %s17_s13, %s17_s13 }
   0xc   :  { %p1229_p5 = scmp.lt.s32.totalorder %s1227_s22, %s1223_s21 }
   0xe   :  { %p1230_p6 = por %p1229_p5, %p1228_p4 }
  0x10   :  { %p1231_p7 = pnand %p1230_p6, %p1224_p3 }
  0x12   :  { %1234 = shalt.err (!%p1231_p7)
}
  0x13   :  { %s1286_s23 = smov 256   ;;  %s1287_s24 = smov 16  }
  0x14   :  { %22 = dma.hbm_to_vmem [thread:$0]  %s1376_s0, 256, %s17_s13, [#allocation3], %s1286_s23, %s1286_s23, %s1287_s24  }
  0x15   :  { %s1288_s27 = smov [#allocation5]   ;;  %s1235_s4 = scalar_lea.hbm %s1377_s1, 8192 }
  0x16   :  { %s28_s28 = sshll.u32 %s1288_s27, 4  ;;  %p1236_p8 = scmp.ne.s32.totalorder %s1377_s1, %s1235_s4  ;;  %s29_s28 = int_to_ptr.vmem [resolvable:$true] %s28_s28 }
  0x17   :  { %p1239_p9 = scmp.lt.u32.totalorder %s1235_s4, %s1377_s1 }
  0x19   :  { %p1241_p10 = pnand %p1239_p9, %p1236_p8 }
  0x1b   :  { %1244 = shalt.err (!%p1241_p10)
}
  0x1c   :  { %s1245_s9 = scalar_lea.vmem %s29_s28, 8192  ;;  %p1250_p12 = scmp.lt.s32.totalorder %s29_s28, %s29_s28 }
  0x1d   :  { %p1246_p11 = scmp.ne.s32.totalorder %s29_s28, %s1245_s9  ;;  %p1251_p13 = scmp.lt.s32.totalorder %s1245_s9, %s1245_s9 }
  0x1f   :  { %p1252_p0 = por %p1251_p13, %p1250_p12 }
  0x21   :  { %p1253_p1 = pnand %p1252_p0, %p1246_p11 }
  0x23   :  { %1256 = shalt.err (!%p1253_p1)
}
  0x24   :  { %s1289_s0 = smov 64   ;;  %s1290_s10 = smov 4  }
  0x25   :  { %34 = dma.hbm_to_vmem [thread:$0]  %s1377_s1, 8192, %s29_s28, [#allocation6], %s1289_s0, %s1289_s0, %s1290_s10  }
  0x26   :  { %1279 = dma.done.wait [#allocation3], 2048  }
  0x27   :  { %1280 = vsyncadd [#allocation3], 4294965248 }
  0x28   :  { %1281 = dma.done.wait [#allocation6], 8192  }
  0x29   :  { %1282 = vsyncadd [#allocation6], 4294959104  ;;  %v1125_v0 = vld [vmem:[#allocation5 + $0x40] sm:$0xff]   ;;  %v1129_v4 = vld [vmem:[#allocation5 + $0x48] sm:$0xff]   ;;  %v1291_v25 = vmov 1983009808   ;;  %v83_v27 = vlaneseq }
  0x2a   :  { %v1126_v1 = vld [vmem:[#allocation5 + $0xc0] sm:$0xff]   ;;  %1029 = vmatprep.subr.bf16.mxu0 %v1125_v0  ;;  %v1130_v5 = vld [vmem:[#allocation5 + $0xc8] sm:$0xff]   ;;  %v1133_v8 = vld [vmem:[#allocation5 + $0x50] sm:$0xff]   ;;  %v81_v26 = vunpack.c.l.s4 %v1291_v25 }
  0x2b   :  { %v1127_v2 = vld [vmem:[#allocation5] sm:$0xff]   ;;  %1051 = vmatprep.subr.bf16.mxu1 %v1126_v1  ;;  %v1131_v6 = vld [vmem:[#allocation5 + $0x8] sm:$0xff]   ;;  %v1134_v9 = vld [vmem:[#allocation5 + $0xd0] sm:$0xff]   ;;  %v84_v33 = vshrl.u32 %v83_v27, 7 }
  0x2c   :  { %v1128_v3 = vld [vmem:[#allocation5 + $0x80] sm:$0xff]   ;;  %1030 = vmatpush3.bf16.msra.mxu0 %v1127_v2  ;;  %v1132_v7 = vld [vmem:[#allocation5 + $0x88] sm:$0xff]   ;;  %v1135_v10 = vld [vmem:[#allocation5 + $0x10] sm:$0xff]   ;;  %v82_v32 = vunpack.c.0.s8 %v81_v26 }
  0x2d   :  { %1052 = vmatpush3.bf16.msra.mxu1 %v1128_v3  ;;  %1031 = vmatprep.subr.bf16.mxu0 %v1129_v4  ;;  %v1136_v11 = vld [vmem:[#allocation5 + $0x90] sm:$0xff]   ;;  %v1137_v12 = vld [vmem:[#allocation5 + $0x58] sm:$0xff]   ;;  %v1141_v16 = vld [vmem:[#allocation5 + $0x60] sm:$0xff]  }
  0x2e   :  { %1053 = vmatprep.subr.bf16.mxu1 %v1130_v5  ;;  %v1138_v13 = vld [vmem:[#allocation5 + $0xd8] sm:$0xff]   ;;  %v1142_v17 = vld [vmem:[#allocation5 + $0xe0] sm:$0xff]   ;;  %v1145_v20 = vld [vmem:[#allocation5 + $0x68] sm:$0xff]   ;;  %v1340_v37 = vsub.s32 %v82_v32, %v84_v33 }
  0x2f   :  { %v1139_v14 = vld [vmem:[#allocation5 + $0x18] sm:$0xff]   ;;  %v1143_v18 = vld [vmem:[#allocation5 + $0x20] sm:$0xff]   ;;  %v1146_v21 = vld [vmem:[#allocation5 + $0xe8] sm:$0xff]  }
  0x30   :  { %1032 = vmatpush3.bf16.msra.mxu0 %v1131_v6  ;;  %v1140_v15 = vld [vmem:[#allocation5 + $0x98] sm:$0xff]   ;;  %v1144_v19 = vld [vmem:[#allocation5 + $0xa0] sm:$0xff]   ;;  %v1147_v22 = vld [vmem:[#allocation5 + $0x28] sm:$0xff]  }
  0x31   :  { %1054 = vmatpush3.bf16.msra.mxu1 %v1132_v7  ;;  %1033 = vmatprep.subr.bf16.mxu0 %v1133_v8  ;;  %v1148_v23 = vld [vmem:[#allocation5 + $0xa8] sm:$0xff]   ;;  %v1149_v24 = vld [vmem:[#allocation5 + $0x70] sm:$0xff]   ;;  %v1153_v31 = vld [vmem:[#allocation5 + $0x78] sm:$0xff]  }
  0x32   :  { %1055 = vmatprep.subr.bf16.mxu1 %v1134_v9  ;;  %v1150_v28 = vld [vmem:[#allocation5 + $0xf0] sm:$0xff]   ;;  %v1154_v34 = vld [vmem:[#allocation5 + $0xf8] sm:$0xff]   ;;  %v1169_v53 = vld [vmem:[#allocation5 + $0x140] sm:$0xff]  }
  0x33   :  { %v1151_v29 = vld [vmem:[#allocation5 + $0x30] sm:$0xff]   ;;  %v1155_v35 = vld [vmem:[#allocation5 + $0x38] sm:$0xff]   ;;  %v1170_v58 = vld [vmem:[#allocation5 + $0x1c0] sm:$0xff]  }
  0x34   :  { %1034 = vmatpush3.bf16.msra.mxu0 %v1135_v10  ;;  %v1152_v30 = vld [vmem:[#allocation5 + $0xb0] sm:$0xff]   ;;  %v1156_v36 = vld [vmem:[#allocation5 + $0xb8] sm:$0xff]   ;;  %v1171_v62 = vld [vmem:[#allocation5 + $0x100] sm:$0xff]  }
  0x35   :  { %1056 = vmatpush3.bf16.msra.mxu1 %v1136_v11  ;;  %1035 = vmatprep.subr.bf16.mxu0 %v1137_v12  ;;  %v1157_v38 = vld [vmem:[#allocation2] ss:$16 sps:$4 sm:$0xff]   ;;  %v1165_v43 = vld [vmem:[#allocation2 + $0x4] ss:$16 sps:$4 sm:$0xff]   ;;  %v1173_v4 = vld [vmem:[#allocation5 + $0x148] sm:$0xff]  }
  0x36   :  { %1057 = vmatprep.subr.bf16.mxu1 %v1138_v13  ;;  %v1159_v39 = vld [vmem:[#allocation2 + $0x20] ss:$16 sps:$4 sm:$0xff]   ;;  %v86_v42 = vrot.slane %v1157_v38, %v1340_v37  ;;  %v1166_v44 = vld [vmem:[#allocation2 + $0x24] ss:$16 sps:$4 sm:$0xff]   ;;  %v93_v50 = vrot.slane %v1165_v43, %v1340_v37  ;;  %v1174_v7 = vld [vmem:[#allocation5 + $0x1c8] sm:$0xff]  }
  0x37   :  { %v1161_v40 = vld [vmem:[#allocation2 + $0x40] ss:$16 sps:$4 sm:$0xff]   ;;  %v1167_v45 = vld [vmem:[#allocation2 + $0x44] ss:$16 sps:$4 sm:$0xff]   ;;  %v100_v46 = vrot.slane %v1159_v39, %v1340_v37  ;;  %v107_v51 = vrot.slane %v1166_v44, %v1340_v37  ;;  %v1175_v8 = vld [vmem:[#allocation5 + $0x108] sm:$0xff]  }
  0x38   :  { %1036 = vmatpush3.bf16.msra.mxu0 %v1139_v14  ;;  %v1163_v41 = vld [vmem:[#allocation2 + $0x60] ss:$16 sps:$4 sm:$0xff]   ;;  %v158_v47 = vrot.slane %v1161_v40, %v1340_v37  ;;  %v1168_v49 = vld [vmem:[#allocation2 + $0x64] ss:$16 sps:$4 sm:$0xff]   ;;  %v165_v52 = vrot.slane %v1167_v45, %v1340_v37  ;;  %v1176_v9 = vld [vmem:[#allocation5 + $0x188] sm:$0xff]  }
  0x39   :  { %1058 = vmatpush3.bf16.msra.mxu1 %v1140_v15  ;;  %1037 = vmatprep.subr.bf16.mxu0 %v1141_v16  ;;  %v172_v48 = vrot.slane %v1163_v41, %v1340_v37  ;;  %v109_v54 = vcombine.high %v86_v42, %v100_v46  ;;  %v179_v56 = vrot.slane %v1168_v49, %v1340_v37  ;;  %v1172_v2 = vld [vmem:[#allocation5 + $0x180] sm:$0xff]   ;;  %v1177_v10 = vld [vmem:[#allocation5 + $0x150] sm:$0xff]   ;;  %v1181_v14 = vld [vmem:[#allocation5 + $0x158] sm:$0xff]  }
  0x3a   :  { %1059 = vmatprep.subr.bf16.mxu1 %v1142_v17  ;;  %v108_v57 = vcombine.low %v86_v42, %v100_v46  ;;  %v111_v59 = vcombine.high %v93_v50, %v107_v51  ;;  %v110_v61 = vcombine.low %v93_v50, %v107_v51  ;;  %v1178_v11 = vld [vmem:[#allocation5 + $0x1d0] sm:$0xff]   ;;  %v1182_v15 = vld [vmem:[#allocation5 + $0x1d8] sm:$0xff]   ;;  %v1192_v25 = vld [vmem:[#allocation5 + $0x1a8] sm:$0xff]  }
  0x3b   :  { %v181_v55 = vcombine.high %v158_v47, %v172_v48  ;;  %v180_v60 = vcombine.low %v158_v47, %v172_v48  ;;  %v183_v0 = vcombine.high %v165_v52, %v179_v56  ;;  %v182_v1 = vcombine.low %v165_v52, %v179_v56  ;;  %v1179_v12 = vld [vmem:[#allocation5 + $0x110] sm:$0xff]   ;;  %v1183_v16 = vld [vmem:[#allocation5 + $0x118] sm:$0xff]  }
  0x3c   :  { %1038 = vmatpush3.bf16.msra.mxu0 %v1143_v18  ;;  %v1180_v13 = vld [vmem:[#allocation5 + $0x190] sm:$0xff]   ;;  %v1184_v17 = vld [vmem:[#allocation5 + $0x198] sm:$0xff]   ;;  %v1185_v18 = vld [vmem:[#allocation5 + $0x160] sm:$0xff]  }
  0x3d   :  { %1060 = vmatpush3.bf16.msra.mxu1 %v1144_v19  ;;  %1039 = vmatprep.subr.bf16.mxu0 %v1145_v20  ;;  %v237_v63 = vpack.c.bf16 %v181_v55, %v109_v54  ;;  %v236_v3 = vpack.c.bf16 %v180_v60, %v108_v57  ;;  %v239_v5 = vpack.c.bf16 %v183_v0, %v111_v59  ;;  %v1186_v19 = vld [vmem:[#allocation5 + $0x1e0] sm:$0xff]   ;;  %v1193_v26 = vld [vmem:[#allocation5 + $0x170] sm:$0xff]   ;;  %v1199_v32 = vld [vmem:[#allocation5 + $0x138] sm:$0xff]  }
  0x3e   :  { %1061 = vmatprep.subr.bf16.mxu1 %v1146_v21  ;;  %v238_v6 = vpack.c.bf16 %v182_v1, %v110_v61  ;;  %v1187_v20 = vld [vmem:[#allocation5 + $0x120] sm:$0xff]   ;;  %v1194_v27 = vld [vmem:[#allocation5 + $0x1f0] sm:$0xff]   ;;  %v1200_v33 = vld [vmem:[#allocation5 + $0x1b8] sm:$0xff]  }
  0x3f   :  { %795 = vmatprep.mubr.bf16.mxu0 %v237_v63  ;;  %836 = vmatprep.mubr.bf16.mxu1 %v239_v5  ;;  %v1188_v21 = vld [vmem:[#allocation5 + $0x1a0] sm:$0xff]   ;;  %v1207_v38 = vld [vmem:[#allocation2 + $0x68] ss:$16 sps:$4 sm:$0xff]   ;;  %v1209_v39 = vld [vmem:[#allocation2 + $0xc] ss:$16 sps:$4 sm:$0xff]  }
  0x40   :  { %1040 = vmatpush3.bf16.msra.mxu0 %v1147_v22  ;;  %v1189_v22 = vld [vmem:[#allocation5 + $0x168] sm:$0xff]   ;;  %v208_v46 = vrot.slane %v1207_v38, %v1340_v37  ;;  %v129_v47 = vrot.slane %v1209_v39, %v1340_v37 }
  0x41   :  { %1062 = vmatpush3.bf16.msra.mxu1 %v1148_v23  ;;  %1041 = vmatprep.subr.bf16.mxu0 %v1149_v24  ;;  %v1190_v23 = vld [vmem:[#allocation5 + $0x1e8] sm:$0xff]  }
  0x42   :  { %1063 = vmatprep.subr.bf16.mxu1 %v1150_v28  ;;  %v1191_v24 = vld [vmem:[#allocation5 + $0x128] sm:$0xff]   ;;  %v1195_v28 = vld [vmem:[#allocation5 + $0x130] sm:$0xff]  }
  0x43   :  { %v1210_v40 = vld [vmem:[#allocation2 + $0x2c] ss:$16 sps:$4 sm:$0xff]  }
  0x44   :  { %1042 = vmatpush3.bf16.msra.mxu0 %v1151_v29  ;;  %v1196_v29 = vld [vmem:[#allocation5 + $0x1b0] sm:$0xff]   ;;  %v1211_v44 = vld [vmem:[#allocation2 + $0x4c] ss:$16 sps:$4 sm:$0xff]   ;;  %v143_v48 = vrot.slane %v1210_v40, %v1340_v37 }
  0x45   :  { %1064 = vmatpush3.bf16.msra.mxu1 %v1152_v30  ;;  %1043 = vmatprep.subr.bf16.mxu0 %v1153_v31  ;;  %v1197_v30 = vld [vmem:[#allocation5 + $0x178] sm:$0xff]   ;;  %v201_v50 = vrot.slane %v1211_v44, %v1340_v37 }
  0x46   :  { %1065 = vmatprep.subr.bf16.mxu1 %v1154_v34  ;;  %v1198_v31 = vld [vmem:[#allocation5 + $0x1f8] sm:$0xff]   ;;  %v147_v54 = vcombine.high %v129_v47, %v143_v48  ;;  %v146_v56 = vcombine.low %v129_v47, %v143_v48 }
  0x47   :  { %v1201_v34 = vld [vmem:[#allocation2 + $0x8] ss:$16 sps:$4 sm:$0xff]   ;;  %v1212_v45 = vld [vmem:[#allocation2 + $0x6c] ss:$16 sps:$4 sm:$0xff]  }
  0x48   :  { %1044 = vmatpush3.bf16.msra.mxu0 %v1155_v35  ;;  %v1203_v35 = vld [vmem:[#allocation2 + $0x28] ss:$16 sps:$4 sm:$0xff]   ;;  %v122_v41 = vrot.slane %v1201_v34, %v1340_v37  ;;  %v215_v51 = vrot.slane %v1212_v45, %v1340_v37 }
  0x49   :  { %1066 = vmatpush3.bf16.msra.mxu1 %v1156_v36  ;;  %1073 = vmatprep.subr.bf16.mxu0 %v1169_v53  ;;  %v1205_v36 = vld [vmem:[#allocation2 + $0x48] ss:$16 sps:$4 sm:$0xff]   ;;  %v136_v42 = vrot.slane %v1203_v35, %v1340_v37 }
  0x4a   :  { %1095 = vmatprep.subr.bf16.mxu1 %v1170_v58  ;;  %v194_v43 = vrot.slane %v1205_v36, %v1340_v37  ;;  %v219_v57 = vcombine.high %v201_v50, %v215_v51  ;;  %v218_v58 = vcombine.low %v201_v50, %v215_v51  ;;  %v955_v37 = vld [vmem:[%s1378_s2] ss:$0 sm:$0xff]  ;;  %s1292_s2 = smov [#allocation7]  }
  0x4b   :  { %796 = vmatmul.mubr.bf16.vlgmr.msra.gmra.mrb[0].mxu0 %v236_v3  ;;  %v145_v49 = vcombine.high %v122_v41, %v136_v42  ;;  %v144_v52 = vcombine.low %v122_v41, %v136_v42  ;;  %s942_s14 = sshll.u32 %s1292_s2, 4  ;;  %s943_s14 = int_to_ptr.vmem [resolvable:$true] %s942_s14 }
  0x4c   :  { %1074 = vmatpush3.bf16.msra.mxu0 %v1171_v62  ;;  %837 = vmatmul.mubr.bf16.vlgmr.msra.gmra.mrb[0].mxu1 %v238_v6  ;;  %v217_v53 = vcombine.high %v194_v43, %v208_v46  ;;  %v216_v55 = vcombine.low %v194_v43, %v208_v46  ;;  %v243_v61 = vpack.c.bf16 %v219_v57, %v147_v54  ;;  %s1257_s15 = scalar_lea.vmem %s943_s14, 128  ;;  %p1262_p3 = scmp.lt.s32.totalorder %s943_s14, %s943_s14 }
  0x4d   :  { %1075 = vmatprep.subr.bf16.mxu0 %v1173_v4  ;;  %1096 = vmatpush3.bf16.msra.mxu1 %v1172_v2  ;;  %v242_v62 = vpack.c.bf16 %v218_v58, %v146_v56  ;;  %p1258_p2 = scmp.ne.s32.totalorder %s943_s14, %s1257_s15  ;;  %p1263_p4 = scmp.lt.s32.totalorder %s1257_s15, %s1257_s15 }
  0x4e   :  { %1097 = vmatprep.subr.bf16.mxu1 %v1174_v7  ;;  %v241_v59 = vpack.c.bf16 %v217_v53, %v145_v49  ;;  %v240_v60 = vpack.c.bf16 %v216_v55, %v144_v52  ;;  %918 = vmatprep.mubr.bf16.mxu1 %v243_v61 }
  0x4f   :  { %p1264_p5 = por %p1263_p4, %p1262_p3 }
  0x50   :  { %1076 = vmatpush3.bf16.msra.mxu0 %v1175_v8  ;;  %877 = vmatprep.mubr.bf16.mxu0 %v241_v59 }
  0x51   :  { %1077 = vmatprep.subr.bf16.mxu0 %v1177_v10  ;;  %1098 = vmatpush3.bf16.msra.mxu1 %v1176_v9  ;;  %p1265_p6 = pnand %p1264_p5, %p1258_p2 }
  0x52   :  { %1099 = vmatprep.subr.bf16.mxu1 %v1178_v11 }
  0x54   :  { %1078 = vmatpush3.bf16.msra.mxu0 %v1179_v12 }
  0x55   :  { %1079 = vmatprep.subr.bf16.mxu0 %v1181_v14  ;;  %1100 = vmatpush3.bf16.msra.mxu1 %v1180_v13 }
  0x56   :  { %1101 = vmatprep.subr.bf16.mxu1 %v1182_v15 }
  0x58   :  { %1080 = vmatpush3.bf16.msra.mxu0 %v1183_v16 }
  0x59   :  { %1081 = vmatprep.subr.bf16.mxu0 %v1185_v18  ;;  %1102 = vmatpush3.bf16.msra.mxu1 %v1184_v17 }
  0x5a   :  { %1103 = vmatprep.subr.bf16.mxu1 %v1186_v19 }
  0x5c   :  { %1082 = vmatpush3.bf16.msra.mxu0 %v1187_v20 }
  0x5d   :  { %1083 = vmatprep.subr.bf16.mxu0 %v1189_v22  ;;  %1104 = vmatpush3.bf16.msra.mxu1 %v1188_v21 }
  0x5e   :  { %1105 = vmatprep.subr.bf16.mxu1 %v1190_v23 }
  0x60   :  { %1084 = vmatpush3.bf16.msra.mxu0 %v1191_v24 }
  0x61   :  { %1085 = vmatprep.subr.bf16.mxu0 %v1193_v26  ;;  %1106 = vmatpush3.bf16.msra.mxu1 %v1192_v25 }
  0x62   :  { %1107 = vmatprep.subr.bf16.mxu1 %v1194_v27 }
  0x64   :  { %1086 = vmatpush3.bf16.msra.mxu0 %v1195_v28 }
  0x65   :  { %1087 = vmatprep.subr.bf16.mxu0 %v1197_v30  ;;  %1108 = vmatpush3.bf16.msra.mxu1 %v1196_v29 }
  0x66   :  { %1109 = vmatprep.subr.bf16.mxu1 %v1198_v31 }
  0x68   :  { %1088 = vmatpush3.bf16.msra.mxu0 %v1199_v32 }
  0x69   :  { %1110 = vmatpush3.bf16.msra.mxu1 %v1200_v33 }
  0x6b   :  { %878 = vmatmul.mubr.bf16.vlgmr.msra.gmra.mrb[4].mxu0 %v240_v60 }
  0x6c   :  { %919 = vmatmul.mubr.bf16.vlgmr.msra.gmra.mrb[4].mxu1 %v242_v62 }
 0x11e   :  { %v1045_v63 = vpop.f32.mrb[0].mxu0 }
 0x11f   :  { %v1046_v0 = vpop.f32.mrb[1].mxu0  ;;  %v1067_v1 = vpop.f32.mrb[0].mxu1 }
 0x120   :  { %v1047_v2 = vadd.f32 %v1046_v0, %v1045_v63  ;;  %v1048_v3 = vpop.f32.mrb[2].mxu0  ;;  %v1068_v4 = vpop.f32.mrb[1].mxu1 }
 0x121   :  { %v1049_v5 = vpop.f32.mrb[3].mxu0  ;;  %v1069_v7 = vadd.f32 %v1068_v4, %v1067_v1  ;;  %v1070_v8 = vpop.f32.mrb[2].mxu1 }
 0x122   :  { %v798_v6 = vadd.f32 %v1047_v2, %v955_v37  ;;  %v1050_v9 = vadd.f32 %v1049_v5, %v1048_v3  ;;  %v1071_v10 = vpop.f32.mrb[3].mxu1 }
 0x123   :  { %v1072_v13 = vadd.f32 %v1071_v10, %v1070_v8 }
 0x124   :  { %v839_v11 = vadd.f32 %v1069_v7, %v798_v6  ;;  %v801_v12 = vadd.f32 %v1050_v9, %v955_v37 }
 0x126   :  { %v842_v14 = vadd.f32 %v1072_v13, %v801_v12 }
 0x13e   :  { %v1089_v15 = vpop.f32.mrb[4].mxu0 }
 0x13f   :  { %v1111_v16 = vpop.f32.mrb[4].mxu1  ;;  %v1090_v17 = vpop.f32.mrb[5].mxu0 }
 0x140   :  { %v1091_v18 = vadd.f32 %v1090_v17, %v1089_v15  ;;  %v1112_v19 = vpop.f32.mrb[5].mxu1  ;;  %v1092_v20 = vpop.f32.mrb[6].mxu0 }
 0x141   :  { %v1113_v21 = vadd.f32 %v1112_v19, %v1111_v16  ;;  %v1114_v22 = vpop.f32.mrb[6].mxu1  ;;  %v1093_v23 = vpop.f32.mrb[7].mxu0 }
 0x142   :  { %v880_v24 = vadd.f32 %v1091_v18, %v839_v11  ;;  %v1094_v25 = vadd.f32 %v1093_v23, %v1092_v20  ;;  %v1115_v26 = vpop.f32.mrb[7].mxu1 }
 0x143   :  { %v1116_v27 = vadd.f32 %v1115_v26, %v1114_v22 }
 0x144   :  { %v921_v28 = vadd.f32 %v1113_v21, %v880_v24  ;;  %v883_v29 = vadd.f32 %v1094_v25, %v842_v14 }
 0x146   :  { %v924_v30 = vadd.f32 %v1116_v27, %v883_v29 }
 0x148   :  { %v1027_v31 = vpack.c.bf16 %v924_v30, %v921_v28 }
 0x14a   :  { %1028 = vst [vmem:[#allocation7] sm:$0xff] %v1027_v31  }
 0x14b   :  { %1268 = shalt.err (!%p1265_p6)
}
 0x14c   :  { %s1269_s18 = scalar_lea.hbm %s1379_s3, 128 }
 0x14d   :  { %p1270_p7 = scmp.ne.s32.totalorder %s1379_s3, %s1269_s18  ;;  %p1273_p8 = scmp.lt.u32.totalorder %s1269_s18, %s1379_s3 }
 0x14f   :  { %p1275_p9 = pnand %p1273_p8, %p1270_p7 }
 0x151   :  { %1278 = shalt.err (!%p1275_p9)
}
 0x152   :  { %948 = dma.vmem_to_hbm [thread:$0]  %s943_s14, 128, %s1379_s3, [#allocation4], %s1289_s0, %s1289_s0, %s1290_s10  }
 0x153   :  { %1283 = dma.done.wait [#allocation4], 128  }
 0x154   :  { %1284 = vsyncadd [#allocation4], 4294967168 }
 0x155   :  { %952 = vsyncpa [#allocation3], 1 }
 0x156   :  { %953 = vsyncpa [#allocation6], 1 }
 0x157   :  { %954 = vsyncpa [#allocation4], 1 }

</bundles_post_ra>
